<compile_context>
chip_gen: v6e
topology: v6e:2x2x1
jax: 0.10.0
libtpu: 0.0.40
codegen_flags: <defaults>
</compile_context>

<pallas_src>
import jax
import jax.numpy as jnp
from jax.experimental import pallas as pl
from jax.experimental.pallas import tpu as pltpu


def pose_loss_kernel(w_ref,
                     p1x_ref, p1q_ref, p2x_ref, p2q_ref, p3x_ref, p3q_ref,
                     gt_ref, out_ref):
    """w_ref: (6,) f32 SMEM = [w1_xyz, w2_xyz, w3_xyz, w1_wpqr, w2_wpqr, w3_wpqr].
    p*x_ref: (B, 3) VMEM, p*q_ref: (B, 4) VMEM, gt_ref: (B, 7) VMEM.
    out_ref: (1, 1) f32 SMEM."""
    gt = gt_ref[...].astype(jnp.float32)                       # (B, 7)
    gt_xyz = gt[:, 0:3]                                        # (B, 3)
    gt_wpqr = gt[:, 3:7]                                       # (B, 4)

    # Normalize GT quaternion: rsqrt(max(sumsq, 1e-16)) == 1 / max(||q||, 1e-8)
    sumsq = jnp.sum(gt_wpqr * gt_wpqr, axis=1, keepdims=True)  # (B, 1)
    inv = jax.lax.rsqrt(jnp.maximum(sumsq, jnp.float32(1e-16)))  # EUP
    gt_wpqr_n = gt_wpqr * inv                                  # (B, 4)

    B = gt_ref.shape[0]
    inv_3b = jnp.float32(1.0 / (3.0 * B))                      # MSE mean factor (xyz)
    inv_4b = jnp.float32(1.0 / (4.0 * B))                      # MSE mean factor (wpqr)

    loss = jnp.float32(0.0)
    branches = ((p1x_ref, p1q_ref, 0, 3),
                (p2x_ref, p2q_ref, 1, 4),
                (p3x_ref, p3q_ref, 2, 5))
    for px_ref, pq_ref, ix, iq in branches:
        dx = px_ref[...].astype(jnp.float32) - gt_xyz          # (B, 3)
        dq = pq_ref[...].astype(jnp.float32) - gt_wpqr_n       # (B, 4)
        loss_xyz = jnp.sum(dx * dx) * inv_3b
        loss_wpqr = jnp.sum(dq * dq) * inv_4b
        loss = loss + w_ref[ix] * (loss_xyz + w_ref[iq] * loss_wpqr)

    out_ref[0, 0] = loss


def pose_loss(p1_xyz, p1_wpqr, p2_xyz, p2_wpqr, p3_xyz, p3_wpqr, poseGT,
              weights_xyz, weights_wpqr):
    B = poseGT.shape[0]
    # (6,) scalar weights -> SMEM; jit leaf argument, so changing values does not recompile.
    w = jnp.concatenate([jnp.asarray(weights_xyz, jnp.float32).reshape(3),
                         jnp.asarray(weights_wpqr, jnp.float32).reshape(3)])

    vmem = pl.BlockSpec(memory_space=pltpu.MemorySpace.VMEM)
    smem = pl.BlockSpec(memory_space=pltpu.MemorySpace.SMEM)

    itemsize = 4  # all touched f32 (bf16 inputs upcast in-kernel; bytes estimate stays conservative)
    cost = pl.CostEstimate(
        flops=80 * B,                 # diffs, squares, weighted sums, quat norm
        transcendentals=B,            # rsqrt per row
        bytes_accessed=(3 * (3 + 4) + 7) * B * itemsize + 6 * 4 + 4,
    )

    out = pl.pallas_call(
        pose_loss_kernel,
        out_shape=jax.ShapeDtypeStruct((1, 1), jnp.float32),
        in_specs=[smem, vmem, vmem, vmem, vmem, vmem, vmem, vmem],
        out_specs=smem,
        cost_estimate=cost,
    )(w, p1_xyz, p1_wpqr, p2_xyz, p2_wpqr, p3_xyz, p3_wpqr, poseGT)
    return out[0, 0]


def pose_loss_ref(p1_xyz, p1_wpqr, p2_xyz, p2_wpqr, p3_xyz, p3_wpqr, poseGT,
                  weights_xyz, weights_wpqr):
    """Pure-JAX reference (mirrors the PyTorch forward)."""
    gt_xyz = poseGT[:, :3]
    gt_wpqr = poseGT[:, 3:]
    n = jnp.maximum(jnp.linalg.norm(gt_wpqr, axis=1, keepdims=True), 1e-8)
    gt_wpqr_n = gt_wpqr / n
    preds_xyz = [p1_xyz, p2_xyz, p3_xyz]
    preds_wpqr = [p1_wpqr, p2_wpqr, p3_wpqr]
    loss = 0.0
    for i in range(3):
        lx = jnp.mean((preds_xyz[i] - gt_xyz) ** 2)
        lw = jnp.mean((preds_wpqr[i] - gt_wpqr_n) ** 2)
        loss = loss + weights_xyz[i] * (lx + weights_wpqr[i] * lw)
    return loss


if __name__ == "__main__":
    # Deterministic weights (typical PoseNet setup: aux branches down-weighted,
    # quaternion term scaled by beta).
    weights_xyz = (0.3, 0.3, 1.0)
    weights_wpqr = (150.0, 150.0, 500.0)

    B = 8
    key = jax.random.PRNGKey(0)
    ks = jax.random.split(key, 7)
    p1_xyz = jax.random.normal(ks[0], (B, 3), jnp.float32)
    p1_wpqr = jax.random.normal(ks[1], (B, 4), jnp.float32)
    p2_xyz = jax.random.normal(ks[2], (B, 3), jnp.float32)
    p2_wpqr = jax.random.normal(ks[3], (B, 4), jnp.float32)
    p3_xyz = jax.random.normal(ks[4], (B, 3), jnp.float32)
    p3_wpqr = jax.random.normal(ks[5], (B, 4), jnp.float32)
    poseGT = jax.random.normal(ks[6], (B, 7), jnp.float32)

    loss_fn = jax.jit(pose_loss)
    loss = loss_fn(p1_xyz, p1_wpqr, p2_xyz, p2_wpqr, p3_xyz, p3_wpqr, poseGT,
                   weights_xyz, weights_wpqr)
    loss = jax.block_until_ready(loss)

    ref = pose_loss_ref(p1_xyz, p1_wpqr, p2_xyz, p2_wpqr, p3_xyz, p3_wpqr,
                        poseGT, weights_xyz, weights_wpqr)
    assert jnp.allclose(loss, ref, rtol=1e-5, atol=1e-5), (loss, ref)

    print("KERNEL_OK")
</pallas_src>

<mosaic_0001>
module attributes {stable_mosaic.version = 11 : i64} {
  func.func @pose_loss_kernel(%arg0: memref<6xf32, #tpu.memory_space<smem>>, %arg1: memref<8x3xf32, #tpu.memory_space<vmem>>, %arg2: memref<8x4xf32, #tpu.memory_space<vmem>>, %arg3: memref<8x3xf32, #tpu.memory_space<vmem>>, %arg4: memref<8x4xf32, #tpu.memory_space<vmem>>, %arg5: memref<8x3xf32, #tpu.memory_space<vmem>>, %arg6: memref<8x4xf32, #tpu.memory_space<vmem>>, %arg7: memref<8x7xf32, #tpu.memory_space<vmem>>, %arg8: memref<1x1xf32, #tpu.memory_space<smem>>) attributes {dimension_semantics = [], scalar_prefetch = 0 : i64, scratch_operands = 0 : i64, tpu.core_type = #tpu.core_type<tc>} {
    %c0 = arith.constant 0 : index
    %c0_0 = arith.constant 0 : index
    %0 = vector.load %arg7[%c0, %c0_0] : memref<8x7xf32, #tpu.memory_space<vmem>>, vector<8x7xf32>
    %1 = vector.extract_strided_slice %0 {offsets = [0, 0], sizes = [8, 3], strides = [1, 1]} : vector<8x7xf32> to vector<8x3xf32>
    %2 = vector.extract_strided_slice %0 {offsets = [0, 3], sizes = [8, 4], strides = [1, 1]} : vector<8x7xf32> to vector<8x4xf32>
    %3 = arith.mulf %2, %2 : vector<8x4xf32>
    %cst = arith.constant dense<0.000000e+00> : vector<8xf32>
    %4 = vector.multi_reduction <add>, %3, %cst [1] : vector<8x4xf32> to vector<8xf32>
    %5 = vector.shape_cast %4 : vector<8xf32> to vector<8x1xf32>
    %cst_1 = arith.constant 1.000000e-16 : f32
    %6 = vector.broadcast %cst_1 : f32 to vector<8x1xf32>
    %7 = arith.maximumf %5, %6 : vector<8x1xf32>
    %8 = math.rsqrt %7 : vector<8x1xf32>
    %9 = vector.broadcast %8 : vector<8x1xf32> to vector<8x4xf32>
    %10 = arith.mulf %2, %9 : vector<8x4xf32>
    %c0_2 = arith.constant 0 : index
    %c0_3 = arith.constant 0 : index
    %11 = vector.load %arg1[%c0_2, %c0_3] : memref<8x3xf32, #tpu.memory_space<vmem>>, vector<8x3xf32>
    %12 = arith.subf %11, %1 : vector<8x3xf32>
    %c0_4 = arith.constant 0 : index
    %c0_5 = arith.constant 0 : index
    %13 = vector.load %arg2[%c0_4, %c0_5] : memref<8x4xf32, #tpu.memory_space<vmem>>, vector<8x4xf32>
    %14 = arith.subf %13, %10 : vector<8x4xf32>
    %15 = arith.mulf %12, %12 : vector<8x3xf32>
    %16 = vector.shape_cast %15 : vector<8x3xf32> to vector<1x8x3xf32>
    %cst_6 = arith.constant dense<0.000000e+00> : vector<1xf32>
    %17 = vector.multi_reduction <add>, %16, %cst_6 [1, 2] : vector<1x8x3xf32> to vector<1xf32>
    %18 = vector.shape_cast %17 : vector<1xf32> to vector<1x1x1xf32>
    %19 = vector.extract %18[0, 0, 0] : f32 from vector<1x1x1xf32>
    %cst_7 = arith.constant 0.0416666679 : f32
    %20 = arith.mulf %19, %cst_7 : f32
    %21 = arith.mulf %14, %14 : vector<8x4xf32>
    %22 = vector.shape_cast %21 : vector<8x4xf32> to vector<1x8x4xf32>
    %cst_8 = arith.constant dense<0.000000e+00> : vector<1xf32>
    %23 = vector.multi_reduction <add>, %22, %cst_8 [1, 2] : vector<1x8x4xf32> to vector<1xf32>
    %24 = vector.shape_cast %23 : vector<1xf32> to vector<1x1x1xf32>
    %25 = vector.extract %24[0, 0, 0] : f32 from vector<1x1x1xf32>
    %cst_9 = arith.constant 3.125000e-02 : f32
    %26 = arith.mulf %25, %cst_9 : f32
    %c0_10 = arith.constant 0 : index
    %27 = memref.load %arg0[%c0_10] : memref<6xf32, #tpu.memory_space<smem>>
    %c3 = arith.constant 3 : index
    %28 = memref.load %arg0[%c3] : memref<6xf32, #tpu.memory_space<smem>>
    %29 = arith.mulf %28, %26 : f32
    %30 = arith.addf %20, %29 : f32
    %31 = arith.mulf %27, %30 : f32
    %cst_11 = arith.constant 0.000000e+00 : f32
    %32 = arith.addf %cst_11, %31 : f32
    %c0_12 = arith.constant 0 : index
    %c0_13 = arith.constant 0 : index
    %33 = vector.load %arg3[%c0_12, %c0_13] : memref<8x3xf32, #tpu.memory_space<vmem>>, vector<8x3xf32>
    %34 = arith.subf %33, %1 : vector<8x3xf32>
    %c0_14 = arith.constant 0 : index
    %c0_15 = arith.constant 0 : index
    %35 = vector.load %arg4[%c0_14, %c0_15] : memref<8x4xf32, #tpu.memory_space<vmem>>, vector<8x4xf32>
    %36 = arith.subf %35, %10 : vector<8x4xf32>
    %37 = arith.mulf %34, %34 : vector<8x3xf32>
    %38 = vector.shape_cast %37 : vector<8x3xf32> to vector<1x8x3xf32>
    %cst_16 = arith.constant dense<0.000000e+00> : vector<1xf32>
    %39 = vector.multi_reduction <add>, %38, %cst_16 [1, 2] : vector<1x8x3xf32> to vector<1xf32>
    %40 = vector.shape_cast %39 : vector<1xf32> to vector<1x1x1xf32>
    %41 = vector.extract %40[0, 0, 0] : f32 from vector<1x1x1xf32>
    %cst_17 = arith.constant 0.0416666679 : f32
    %42 = arith.mulf %41, %cst_17 : f32
    %43 = arith.mulf %36, %36 : vector<8x4xf32>
    %44 = vector.shape_cast %43 : vector<8x4xf32> to vector<1x8x4xf32>
    %cst_18 = arith.constant dense<0.000000e+00> : vector<1xf32>
    %45 = vector.multi_reduction <add>, %44, %cst_18 [1, 2] : vector<1x8x4xf32> to vector<1xf32>
    %46 = vector.shape_cast %45 : vector<1xf32> to vector<1x1x1xf32>
    %47 = vector.extract %46[0, 0, 0] : f32 from vector<1x1x1xf32>
    %cst_19 = arith.constant 3.125000e-02 : f32
    %48 = arith.mulf %47, %cst_19 : f32
    %c1 = arith.constant 1 : index
    %49 = memref.load %arg0[%c1] : memref<6xf32, #tpu.memory_space<smem>>
    %c4 = arith.constant 4 : index
    %50 = memref.load %arg0[%c4] : memref<6xf32, #tpu.memory_space<smem>>
    %51 = arith.mulf %50, %48 : f32
    %52 = arith.addf %42, %51 : f32
    %53 = arith.mulf %49, %52 : f32
    %54 = arith.addf %32, %53 : f32
    %c0_20 = arith.constant 0 : index
    %c0_21 = arith.constant 0 : index
    %55 = vector.load %arg5[%c0_20, %c0_21] : memref<8x3xf32, #tpu.memory_space<vmem>>, vector<8x3xf32>
    %56 = arith.subf %55, %1 : vector<8x3xf32>
    %c0_22 = arith.constant 0 : index
    %c0_23 = arith.constant 0 : index
    %57 = vector.load %arg6[%c0_22, %c0_23] : memref<8x4xf32, #tpu.memory_space<vmem>>, vector<8x4xf32>
    %58 = arith.subf %57, %10 : vector<8x4xf32>
    %59 = arith.mulf %56, %56 : vector<8x3xf32>
    %60 = vector.shape_cast %59 : vector<8x3xf32> to vector<1x8x3xf32>
    %cst_24 = arith.constant dense<0.000000e+00> : vector<1xf32>
    %61 = vector.multi_reduction <add>, %60, %cst_24 [1, 2] : vector<1x8x3xf32> to vector<1xf32>
    %62 = vector.shape_cast %61 : vector<1xf32> to vector<1x1x1xf32>
    %63 = vector.extract %62[0, 0, 0] : f32 from vector<1x1x1xf32>
    %cst_25 = arith.constant 0.0416666679 : f32
    %64 = arith.mulf %63, %cst_25 : f32
    %65 = arith.mulf %58, %58 : vector<8x4xf32>
    %66 = vector.shape_cast %65 : vector<8x4xf32> to vector<1x8x4xf32>
    %cst_26 = arith.constant dense<0.000000e+00> : vector<1xf32>
    %67 = vector.multi_reduction <add>, %66, %cst_26 [1, 2] : vector<1x8x4xf32> to vector<1xf32>
    %68 = vector.shape_cast %67 : vector<1xf32> to vector<1x1x1xf32>
    %69 = vector.extract %68[0, 0, 0] : f32 from vector<1x1x1xf32>
    %cst_27 = arith.constant 3.125000e-02 : f32
    %70 = arith.mulf %69, %cst_27 : f32
    %c2 = arith.constant 2 : index
    %71 = memref.load %arg0[%c2] : memref<6xf32, #tpu.memory_space<smem>>
    %c5 = arith.constant 5 : index
    %72 = memref.load %arg0[%c5] : memref<6xf32, #tpu.memory_space<smem>>
    %73 = arith.mulf %72, %70 : f32
    %74 = arith.addf %64, %73 : f32
    %75 = arith.mulf %71, %74 : f32
    %76 = arith.addf %54, %75 : f32
    %c0_28 = arith.constant 0 : index
    %c0_29 = arith.constant 0 : index
    %77 = memref.load %arg8[%c0_28, %c0_29] : memref<1x1xf32, #tpu.memory_space<smem>>
    memref.store %76, %arg8[%c0_28, %c0_29] : memref<1x1xf32, #tpu.memory_space<smem>>
    return
  }
}

</mosaic_0001>

<bundles_post_ra>
// kernel: pose_loss.1
= control target key start
LH: loop header
LB: loop body
LE: loop exit
PB: predicated region body
PF: predicated region fallthrough
CT: control target
= control target key end

     0   :  { %13 = vsyncpa [#allocation4], 0  ;;  %s307_s0 = inlined_call_operand.vmem [shape: f32[6], index: 0, kind: input, shape index: {}]   ;;  %s308_s1 = inlined_call_operand.vmem [shape: f32[8,3], index: 1, kind: input, shape index: {}]   ;;  %s309_s2 = inlined_call_operand.vmem [shape: f32[8,4], index: 2, kind: input, shape index: {}]   ;;  %s310_s3 = inlined_call_operand.vmem [shape: f32[8,3], index: 3, kind: input, shape index: {}]   ;;  %s311_s4 = inlined_call_operand.vmem [shape: f32[8,4], index: 4, kind: input, shape index: {}]   ;;  %s312_s5 = inlined_call_operand.vmem [shape: f32[8,3], index: 5, kind: input, shape index: {}]   ;;  %s313_s6 = inlined_call_operand.vmem [shape: f32[8,4], index: 6, kind: input, shape index: {}]   ;;  %s314_s7 = inlined_call_operand.vmem [shape: f32[8,7], index: 7, kind: input, shape index: {}]   ;;  %s315_s8 = inlined_call_operand.hbm [shape: f32[1,1], index: 8, kind: output, shape index: {}]  }
   0x1   :  { %14 = vsyncpa [#allocation3], 0  ;;  %s21_s29 = sshll.u32 %s307_s0, 4  ;;  %s22_s29 = int_to_ptr.vmem [resolvable:$true] %s21_s29 }
   0x2   :  { %s201_s30 = scalar_lea.vmem %s22_s29, 16  ;;  %p206_p1 = scmp.lt.s32.totalorder %s22_s29, %s22_s29 }
   0x3   :  { %p202_p0 = scmp.ne.s32.totalorder %s22_s29, %s201_s30  ;;  %p207_p2 = scmp.lt.s32.totalorder %s201_s30, %s201_s30 }
   0x5   :  { %p208_p3 = por %p207_p2, %p206_p1 }
   0x7   :  { %p209_p4 = pnand %p208_p3, %p202_p0 }
   0x9   :  { %212 = shalt.err (!%p209_p4)
}
   0xa   :  { %s225_s9 = smov [#allocation2]  }
   0xb   :  { %24 = dma.vmem_to_smem %s22_s29, 16, %s225_s9, [#allocation4]  }
   0xc   :  { %221 = dma.done.wait [#allocation4], 16  }
   0xd   :  { %222 = vsyncadd [#allocation4], 4294967280 }
   0xe   :  { %42 = sfence }
   0xf   :  { %v43_v0 = vld [vmem:[%s314_s7] sm:$0xff]  ;;  %s226_s12 = smov 125   ;;  %vm49_vm0 = vcmask 31744   ;;  %vm65_vm1 = vcmask 23552   ;;  %s180_s22 = sld [smem:[#allocation2 + $0x1]] }
  0x10   :  { %v44_v1 = vmul.f32 %v43_v0, %v43_v0  ;;  %v95_v4 = vld [vmem:[%s310_s3] sm:$0xff]  ;;  %s182_s30 = sld [smem:[#allocation2 + $0x2]]  ;;  %s227_s21 = smov [#allocation5]  }
  0x11   :  { %v96_v5 = vsub.f32 %v95_v4, %v43_v0  ;;  %v56_v12 = vld [vmem:[%s308_s1] sm:$0xff]  ;;  %s179_s1 = sld [smem:[#allocation2 + $0x3]] }
  0x12   :  { %46 = vrot.lane.b32.xlu0 %v44_v1, %s226_s12  ;;  %v57_v13 = vsub.f32 %v56_v12, %v43_v0  ;;  %v129_v16 = vld [vmem:[%s312_s5] sm:$0xff]  ;;  %s183_s5 = sld [smem:[#allocation2 + $0x5]] }
  0x13   :  { %v99_v6 = vmul.f32 %v96_v5, %v96_v5  ;;  %v97_v17 = vld [vmem:[%s311_s4] sm:$0xff]  ;;  %v130_v20 = vsub.f32 %v129_v16, %v43_v0 }
  0x14   :  { %v64_v14 = vmul.f32 %v57_v13, %v57_v13  ;;  %v58_v18 = vld [vmem:[%s309_s2] sm:$0xff]  ;;  %s181_s2 = sld [smem:[#allocation2 + $0x4]] }
  0x15   :  { %v100_v7 = vsel %vm65_vm1, %v99_v6, 0.0  ;;  %v131_v19 = vld [vmem:[%s313_s6] sm:$0xff]  ;;  %v133_v27 = vmul.f32 %v130_v20, %v130_v20  ;;  %s89_s6 = sld [smem:[#allocation2]] }
  0x16   :  { %v66_v15 = vsel %vm65_vm1, %v64_v14, 0.0 }
  0x17   :  { %v134_v31 = vsel %vm65_vm1, %v133_v27, 0.0 }
  0x84   :  { %v47_v2 = vpop.permute.xlu0 %46 }
  0x85   :  { %v50_v3 = vsel %vm49_vm0, %v47_v2, 0.0 }
  0x86   :  { %51 = vadd.xlane.f32.xlu0 %v50_v3 }
  0x8a   :  { %101 = vadd.xlane.f32.xlu0 %v100_v7 }
 0x10f   :  { %v52_v8 = vpop.xlane.xlu0 %51 }
 0x110   :  { %v53_v9 = vmax.f32 %v52_v8, 1e-16 }
 0x112   :  { %199 = vrsqrt.f32 %v53_v9 }
 0x113   :  { %v102_v40 = vpop.xlane.xlu0 %101 }
 0x114   :  { %v103_v41 = vrot.slane %v102_v40, 4 }
 0x116   :  { %v104_v42 = vadd.f32 %v103_v41, %v102_v40 }
 0x118   :  { %v105_v43 = vrot.slane %v104_v42, 2 }
 0x11a   :  { %v106_v52 = vadd.f32 %v105_v43, %v104_v42 }
 0x11c   :  { %v107_v61 = vrot.slane %v106_v52, 1 }
 0x11e   :  { %v108_v6 = vadd.f32 %v107_v61, %v106_v52 }
 0x11f   :  { %v200_v10 = vpop.eup %199 }
 0x120   :  { %v55_v11 = vmul.f32 %v200_v10, %v43_v0 }
 0x122   :  { %60 = vrot.lane.b32.xlu1 %v55_v11, %s226_s12 }
 0x146   :  { %67 = vadd.xlane.f32.xlu1 %v66_v15 }
 0x194   :  { %v61_v21 = vpop.permute.xlu1 %60 }
 0x195   :  { %v98_v22 = vsub.f32 %v97_v17, %v61_v21  ;;  %v63_v23 = vsub.f32 %v58_v18, %v61_v21  ;;  %v132_v24 = vsub.f32 %v131_v19, %v61_v21 }
 0x197   :  { %v111_v25 = vmul.f32 %v98_v22, %v98_v22  ;;  %v77_v26 = vmul.f32 %v63_v23, %v63_v23  ;;  %v145_v30 = vmul.f32 %v132_v24, %v132_v24 }
 0x199   :  { %v112_v28 = vsel %vm49_vm0, %v111_v25, 0.0  ;;  %v78_v29 = vsel %vm49_vm0, %v77_v26, 0.0  ;;  %v146_v32 = vsel %vm49_vm0, %v145_v30, 0.0 }
 0x19a   :  { %113 = vadd.xlane.f32.xlu1 %v112_v28  ;;  %79 = vadd.xlane.f32.xlu0 %v78_v29 }
 0x19e   :  { %147 = vadd.xlane.f32.xlu1 %v146_v32  ;;  %135 = vadd.xlane.f32.xlu0 %v134_v31 }
 0x1cf   :  { %v68_v33 = vpop.xlane.xlu1 %67 }
 0x1d0   :  { %v69_v34 = vrot.slane %v68_v33, 4 }
 0x1d2   :  { %v70_v35 = vadd.f32 %v69_v34, %v68_v33 }
 0x1d4   :  { %v71_v36 = vrot.slane %v70_v35, 2 }
 0x1d6   :  { %v72_v37 = vadd.f32 %v71_v36, %v70_v35 }
 0x1d8   :  { %v73_v38 = vrot.slane %v72_v37, 1 }
 0x1da   :  { %v74_v39 = vadd.f32 %v73_v38, %v72_v37 }
 0x1dc   :  { %184 = vpush %v74_v39 }
 0x20d   :  { %s185_s4 = spop %184 }
 0x20e   :  { %s76_s23 = smul.f32 0.041666668, %s185_s4 }
 0x223   :  { %v114_v44 = vpop.xlane.xlu1 %113  ;;  %v80_v45 = vpop.xlane.xlu0 %79 }
 0x224   :  { %v115_v46 = vrot.slane %v114_v44, 4  ;;  %v81_v47 = vrot.slane %v80_v45, 4 }
 0x226   :  { %v116_v48 = vadd.f32 %v115_v46, %v114_v44  ;;  %v82_v49 = vadd.f32 %v81_v47, %v80_v45 }
 0x227   :  { %v148_v50 = vpop.xlane.xlu1 %147  ;;  %v136_v51 = vpop.xlane.xlu0 %135 }
 0x228   :  { %v117_v53 = vrot.slane %v116_v48, 2  ;;  %v83_v54 = vrot.slane %v82_v49, 2  ;;  %v149_v55 = vrot.slane %v148_v50, 4  ;;  %v137_v56 = vrot.slane %v136_v51, 4 }
 0x22a   :  { %v150_v57 = vadd.f32 %v149_v55, %v148_v50  ;;  %v138_v58 = vadd.f32 %v137_v56, %v136_v51  ;;  %v84_v59 = vadd.f32 %v83_v54, %v82_v49  ;;  %v118_v60 = vadd.f32 %v117_v53, %v116_v48 }
 0x22c   :  { %v151_v62 = vrot.slane %v150_v57, 2  ;;  %v139_v63 = vrot.slane %v138_v58, 2  ;;  %v85_v0 = vrot.slane %v84_v59, 1  ;;  %v119_v1 = vrot.slane %v118_v60, 1 }
 0x22e   :  { %v152_v2 = vadd.f32 %v151_v62, %v150_v57  ;;  %v140_v3 = vadd.f32 %v139_v63, %v138_v58  ;;  %v86_v4 = vadd.f32 %v85_v0, %v84_v59  ;;  %v120_v5 = vadd.f32 %v119_v1, %v118_v60 }
 0x230   :  { %186 = vpush %v86_v4  ;;  %v141_v7 = vrot.slane %v140_v3, 1  ;;  %v153_v8 = vrot.slane %v152_v2, 1 }
 0x231   :  { %188 = vpush %v108_v6 }
 0x232   :  { %190 = vpush %v120_v5  ;;  %v142_v9 = vadd.f32 %v141_v7, %v140_v3  ;;  %v154_v10 = vadd.f32 %v153_v8, %v152_v2 }
 0x234   :  { %192 = vpush %v142_v9 }
 0x235   :  { %194 = vpush %v154_v10 }
 0x261   :  { %s187_s24 = spop %186 }
 0x262   :  { %s88_s25 = smul.f32 0.03125, %s187_s24  ;;  %s189_s26 = spop %188 }
 0x263   :  { %s110_s27 = smul.f32 0.041666668, %s189_s26  ;;  %s191_s28 = spop %190 }
 0x264   :  { %s91_s29 = smul.f32 %s179_s1, %s88_s25 }
 0x265   :  { %s122_s9 = smul.f32 0.03125, %s191_s28  ;;  %s193_s10 = spop %192 }
 0x266   :  { %s92_s11 = sadd.f32 %s91_s29, %s76_s23  ;;  %s144_s12 = smul.f32 0.041666668, %s193_s10 }
 0x267   :  { %s125_s0 = smul.f32 %s181_s2, %s122_s9  ;;  %s195_s13 = spop %194 }
 0x268   :  { %s156_s7 = smul.f32 0.03125, %s195_s13 }
 0x269   :  { %s126_s14 = sadd.f32 %s125_s0, %s110_s27  ;;  %s93_s3 = smul.f32 %s92_s11, %s89_s6 }
 0x26a   :  { %s159_s15 = smul.f32 %s183_s5, %s156_s7 }
 0x26b   :  { %s127_s16 = smul.f32 %s180_s22, %s126_s14 }
 0x26c   :  { %s160_s17 = sadd.f32 %s159_s15, %s144_s12 }
 0x26d   :  { %s128_s18 = sadd.f32 %s127_s16, %s93_s3 }
 0x26e   :  { %s161_s19 = smul.f32 %s182_s30, %s160_s17 }
 0x270   :  { %s162_s20 = sadd.f32 %s161_s19, %s128_s18 }
 0x272   :  { %164 = sst [smem:[#allocation5]] %s162_s20 }
 0x273   :  { %172 = dma.smem_to_hbm %s227_s21, 16, %s315_s8, [#allocation3]  }
 0x274   :  { %223 = dma.done.wait [#allocation3], 16  }
 0x275   :  { %224 = vsyncadd [#allocation3], 4294967280 }
 0x276   :  { %176 = sfence }
 0x277   :  { %177 = vsyncpa [#allocation3], 1 }
 0x278   :  { %178 = vsyncpa [#allocation4], 1 }

</bundles_post_ra>
